<compile_context>
chip_gen: v7x
topology: tpu7x:2x2x1
jax: 0.10.0
libtpu: 0.0.40
codegen_flags: <defaults>
</compile_context>

<pallas_src>
import jax
import jax.numpy as jnp
from jax.experimental import pallas as pl
from jax.experimental.pallas import tpu as pltpu

LANE = 128
SUBLANE = 8


def _round_up(n, m):
    return ((n + m - 1) // m) * m


# ----------------------------------------------------------------------------
# Kernel: full forward pass fused, weights/biases VMEM-resident across steps.
# ----------------------------------------------------------------------------
def autoencoder_kernel(
    x_ref,
    ew1_ref, eb1_ref,      # encoder.fc1_hidden
    ew2_ref, eb2_ref,      # encoder.fc2_hidden
    ew3_ref, eb3_ref,      # encoder.fc2_botlneck
    dw1_ref, db1_ref,      # decoder.fc1
    dw2_ref, db2_ref,      # decoder.fc2
    enc_ref, dec_ref,
):
    wdt = ew1_ref.dtype                       # matmul operand dtype (bf16 or f32)
    x = x_ref[...].astype(wdt)

    # ---- Encoder ----
    h = jnp.dot(x, ew1_ref[...], preferred_element_type=jnp.float32) + eb1_ref[...]
    h = jnp.maximum(h, 0.0)
    h = jnp.dot(h.astype(wdt), ew2_ref[...], preferred_element_type=jnp.float32) + eb2_ref[...]
    h = jnp.maximum(h, 0.0)
    enc = jnp.dot(h.astype(wdt), ew3_ref[...], preferred_element_type=jnp.float32) + eb3_ref[...]
    enc_ref[...] = enc.astype(enc_ref.dtype)

    # ---- Decoder ----  (dropout p=0.2 in eval mode == identity)
    d = jnp.dot(enc.astype(wdt), dw1_ref[...], preferred_element_type=jnp.float32) + db1_ref[...]
    d = jnp.maximum(d, 0.0)
    dec = jnp.dot(d.astype(wdt), dw2_ref[...], preferred_element_type=jnp.float32) + db2_ref[...]
    dec_ref[...] = dec.astype(dec_ref.dtype)


# ----------------------------------------------------------------------------
# Parameter prep: pad ONLY the HBM-stored output lane dims (bottleneck for the
# encoder output, input_size for the decoder output) to 128 lanes; the matching
# decoder fan-in is padded with zero rows.  Everything else stays true-size.
# ----------------------------------------------------------------------------
def prepare_params(params, param_dtype=jnp.bfloat16):
    """params: dict of (in,out) weights 'e/dW*' and (1,out) biases, all f32.
    Returns weights in `param_dtype` and f32 biases, padded as described."""
    bn_pad = _round_up(params["ew3"].shape[1], LANE)     # encoded lane dim
    out_pad = _round_up(params["dw2"].shape[1], LANE)    # decoded lane dim

    def as_w(w, fi_pad=None, fo_pad=None):
        fi, fo = w.shape
        fi_pad = fi if fi_pad is None else fi_pad
        fo_pad = fo if fo_pad is None else fo_pad
        if (fi_pad, fo_pad) == (fi, fo):
            return w.astype(param_dtype)
        out = jnp.zeros((fi_pad, fo_pad), param_dtype)
        return out.at[:fi, :fo].set(w.astype(param_dtype))

    def as_b(b, fo_pad=None):
        fo = b.shape[1]
        fo_pad = fo if fo_pad is None else fo_pad
        if fo_pad == fo:
            return b.astype(jnp.float32)
        return jnp.zeros((1, fo_pad), jnp.float32).at[:, :fo].set(b.astype(jnp.float32))

    return dict(
        ew1=as_w(params["ew1"]),                 eb1=as_b(params["eb1"]),
        ew2=as_w(params["ew2"]),                 eb2=as_b(params["eb2"]),
        ew3=as_w(params["ew3"], fo_pad=bn_pad),  eb3=as_b(params["eb3"], fo_pad=bn_pad),
        dw1=as_w(params["dw1"], fi_pad=bn_pad),  db1=as_b(params["db1"]),
        dw2=as_w(params["dw2"], fo_pad=out_pad), db2=as_b(params["db2"], fo_pad=out_pad),
    )


# ----------------------------------------------------------------------------
# Wrapper
# ----------------------------------------------------------------------------
def model_autoencoder_forward(x, padded_params, *, input_size, bottleneck_size,
                              tile_b=1024, out_dtype=jnp.float32):
    """x: (B, input_size) f32.  padded_params: output of prepare_params()."""
    B, in_feat = x.shape
    assert in_feat == input_size

    p = padded_params
    assert p["ew1"].shape[0] == in_feat
    H = p["ew1"].shape[1]            # true hidden dim
    BN_PAD = p["ew3"].shape[1]       # lane-padded bottleneck
    OUT_PAD = p["dw2"].shape[1]      # lane-padded output

    # Batch tiling: sublane-multiple tile; pad only a few batch rows if needed.
    tile_b = max(SUBLANE, min(tile_b, _round_up(B, SUBLANE)))
    if B >= 2 * SUBLANE:
        # Ensure >=2 grid steps so both v7x TensorCores get work ("parallel" axis).
        tile_b = min(tile_b, _round_up(-(-B // 2), SUBLANE))
    B_pad = _round_up(B, tile_b)
    x_p = x if B_pad == B else jnp.zeros((B_pad, in_feat), x.dtype).at[:B].set(x)

    grid = (B_pad // tile_b,)

    # Batch-tiled specs for x / outputs; weights & biases resident (constant block).
    x_spec = pl.BlockSpec((tile_b, in_feat), lambda i: (i, 0))
    enc_spec = pl.BlockSpec((tile_b, BN_PAD), lambda i: (i, 0))
    dec_spec = pl.BlockSpec((tile_b, OUT_PAD), lambda i: (i, 0))

    def resident(arr):
        return pl.BlockSpec(arr.shape, lambda i: (0, 0))

    weight_args = (
        p["ew1"], p["eb1"], p["ew2"], p["eb2"], p["ew3"], p["eb3"],
        p["dw1"], p["db1"], p["dw2"], p["db2"],
    )

    # Cost estimate from TRUE (unpadded) dims.
    flops = 2 * B * (input_size * H + H * H + H * bottleneck_size
                     + bottleneck_size * H + H * input_size)
    out_itemsize = jnp.dtype(out_dtype).itemsize
    weight_bytes = sum(int(w.size) * w.dtype.itemsize for w in weight_args)
    bytes_accessed = (
        B * input_size * x.dtype.itemsize
        + weight_bytes
        + B * bottleneck_size * out_itemsize
        + B * input_size * out_itemsize)

    # VMEM budget: double-buffered x/enc/dec tiles + resident weights + headroom,
    # clamped to v7x's 64 MiB per-TC VMEM.
    tile_bytes = tile_b * (in_feat * x.dtype.itemsize
                           + (BN_PAD + OUT_PAD) * out_itemsize)
    vmem_budget = 2 * tile_bytes + weight_bytes + (4 << 20)
    vmem_limit = int(min(max(vmem_budget, 16 << 20), 64 << 20))

    encoded, decoded = pl.pallas_call(
        autoencoder_kernel,
        out_shape=(
            jax.ShapeDtypeStruct((B_pad, BN_PAD), out_dtype),
            jax.ShapeDtypeStruct((B_pad, OUT_PAD), out_dtype),
        ),
        grid=grid,
        in_specs=[x_spec] + [resident(w) for w in weight_args],
        out_specs=(enc_spec, dec_spec),
        compiler_params=pltpu.CompilerParams(
            dimension_semantics=("parallel",),
            vmem_limit_bytes=vmem_limit),
        cost_estimate=pl.CostEstimate(
            flops=int(flops), transcendentals=0,
            bytes_accessed=int(bytes_accessed)),
    )(x_p, *weight_args)

    return encoded[:B, :bottleneck_size], decoded[:B, :input_size]


# ----------------------------------------------------------------------------
# Synthetic params + pure-JAX reference
# ----------------------------------------------------------------------------
def init_params(key, input_size, n_hidden, bottleneck_size):
    """PyTorch-Linear-like uniform fan_in init; weights stored as (in, out)."""
    def linear(key, fan_in, fan_out):
        kw, kb = jax.random.split(key)
        bound = 1.0 / jnp.sqrt(fan_in)
        w = jax.random.uniform(kw, (fan_in, fan_out), jnp.float32, -bound, bound)
        b = jax.random.uniform(kb, (1, fan_out), jnp.float32, -bound, bound)
        return w, b

    keys = jax.random.split(key, 5)
    ew1, eb1 = linear(keys[0], input_size, n_hidden)
    ew2, eb2 = linear(keys[1], n_hidden, n_hidden)
    ew3, eb3 = linear(keys[2], n_hidden, bottleneck_size)
    dw1, db1 = linear(keys[3], bottleneck_size, n_hidden)
    dw2, db2 = linear(keys[4], n_hidden, input_size)
    return dict(ew1=ew1, eb1=eb1, ew2=ew2, eb2=eb2, ew3=ew3, eb3=eb3,
                dw1=dw1, db1=db1, dw2=dw2, db2=db2)


def _reference(x, p):
    relu = lambda v: jnp.maximum(v, 0.0)
    h = relu(x @ p["ew1"] + p["eb1"])
    h = relu(h @ p["ew2"] + p["eb2"])
    enc = h @ p["ew3"] + p["eb3"]
    d = relu(enc @ p["dw1"] + p["db1"])
    dec = d @ p["dw2"] + p["db2"]
    return enc, dec


if __name__ == "__main__":
    key = jax.random.PRNGKey(0)
    k_x, k_p = jax.random.split(key)

    batch = 8
    input_size = 32
    n_hidden = 32
    bottleneck_size = 16

    x = jax.random.normal(k_x, (batch, input_size), dtype=jnp.float32)
    params = init_params(k_p, input_size, n_hidden, bottleneck_size)
    enc_ref, dec_ref = _reference(x, params)

    # --- f32 weights: tight check ---
    p_f32 = prepare_params(params, jnp.float32)
    enc, dec = model_autoencoder_forward(
        x, p_f32, input_size=input_size, bottleneck_size=bottleneck_size)
    jax.block_until_ready((enc, dec))
    assert enc.shape == (batch, bottleneck_size)
    assert dec.shape == (batch, input_size)
    assert jnp.allclose(enc, enc_ref, atol=2e-4, rtol=2e-4)
    assert jnp.allclose(dec, dec_ref, atol=2e-4, rtol=2e-4)

    # --- bf16 weights (default; halved weight DMA, native MXU bf16 path):
    #     activations are also cast to bf16 before each matmul, acc stays f32.
    p_bf16 = prepare_params(params)          # bf16 default
    enc16, dec16 = model_autoencoder_forward(
        x, p_bf16, input_size=input_size, bottleneck_size=bottleneck_size)
    jax.block_until_ready((enc16, dec16))
    assert jnp.allclose(enc16, enc_ref, atol=5e-2, rtol=5e-2)
    assert jnp.allclose(dec16, dec_ref, atol=5e-2, rtol=5e-2)

    print("KERNEL_OK")
</pallas_src>

<mosaic_0001>
module attributes {stable_mosaic.version = 11 : i64} {
  func.func @autoencoder_kernel(%arg0: i32, %arg1: memref<8x32xf32, #tpu.memory_space<vmem>>, %arg2: memref<32x32xf32, #tpu.memory_space<vmem>>, %arg3: memref<1x32xf32, #tpu.memory_space<vmem>>, %arg4: memref<32x32xf32, #tpu.memory_space<vmem>>, %arg5: memref<1x32xf32, #tpu.memory_space<vmem>>, %arg6: memref<32x128xf32, #tpu.memory_space<vmem>>, %arg7: memref<1x128xf32, #tpu.memory_space<vmem>>, %arg8: memref<128x32xf32, #tpu.memory_space<vmem>>, %arg9: memref<1x32xf32, #tpu.memory_space<vmem>>, %arg10: memref<32x128xf32, #tpu.memory_space<vmem>>, %arg11: memref<1x128xf32, #tpu.memory_space<vmem>>, %arg12: memref<8x128xf32, #tpu.memory_space<vmem>>, %arg13: memref<8x128xf32, #tpu.memory_space<vmem>>) attributes {dimension_semantics = [#tpu.dimension_semantics<parallel>], iteration_bounds = array<i64: 1>, scalar_prefetch = 0 : i64, scratch_operands = 0 : i64, tpu.core_type = #tpu.core_type<tc>, window_params = [{transform_indices = @transform_0, window_bounds = array<i64: 8, 32>}, {pipeline_mode = #tpu.pipeline_mode<synchronous>, transform_indices = @transform_1, window_bounds = array<i64: 32, 32>}, {pipeline_mode = #tpu.pipeline_mode<synchronous>, transform_indices = @transform_2, window_bounds = array<i64: 1, 32>}, {pipeline_mode = #tpu.pipeline_mode<synchronous>, transform_indices = @transform_3, window_bounds = array<i64: 32, 32>}, {pipeline_mode = #tpu.pipeline_mode<synchronous>, transform_indices = @transform_4, window_bounds = array<i64: 1, 32>}, {pipeline_mode = #tpu.pipeline_mode<synchronous>, transform_indices = @transform_5, window_bounds = array<i64: 32, 128>}, {pipeline_mode = #tpu.pipeline_mode<synchronous>, transform_indices = @transform_6, window_bounds = array<i64: 1, 128>}, {pipeline_mode = #tpu.pipeline_mode<synchronous>, transform_indices = @transform_7, window_bounds = array<i64: 128, 32>}, {pipeline_mode = #tpu.pipeline_mode<synchronous>, transform_indices = @transform_8, window_bounds = array<i64: 1, 32>}, {pipeline_mode = #tpu.pipeline_mode<synchronous>, transform_indices = @transform_9, window_bounds = array<i64: 32, 128>}, {pipeline_mode = #tpu.pipeline_mode<synchronous>, transform_indices = @transform_10, window_bounds = array<i64: 1, 128>}, {transform_indices = @transform_11, window_bounds = array<i64: 8, 128>}, {transform_indices = @transform_12, window_bounds = array<i64: 8, 128>}]} {
    %c0 = arith.constant 0 : index
    %c0_0 = arith.constant 0 : index
    %0 = vector.load %arg1[%c0, %c0_0] : memref<8x32xf32, #tpu.memory_space<vmem>>, vector<8x32xf32>
    %c0_1 = arith.constant 0 : index
    %c0_2 = arith.constant 0 : index
    %1 = vector.load %arg2[%c0_1, %c0_2] : memref<32x32xf32, #tpu.memory_space<vmem>>, vector<32x32xf32>
    %cst = arith.constant dense<0.000000e+00> : vector<8x32xf32>
    %2 = tpu.matmul %0, %1, %cst {dimension_numbers = #tpu.dot_dimension_numbers<[1], [0], [0], [1], [0, 0, 1, 1], [], []>} : vector<8x32xf32>, vector<32x32xf32>, vector<8x32xf32> -> vector<8x32xf32>
    %c0_3 = arith.constant 0 : index
    %c0_4 = arith.constant 0 : index
    %3 = vector.load %arg3[%c0_3, %c0_4] : memref<1x32xf32, #tpu.memory_space<vmem>>, vector<1x32xf32>
    %4 = vector.broadcast %3 : vector<1x32xf32> to vector<8x32xf32>
    %5 = arith.addf %2, %4 : vector<8x32xf32>
    %cst_5 = arith.constant 0.000000e+00 : f32
    %6 = vector.broadcast %cst_5 : f32 to vector<8x32xf32>
    %7 = arith.maximumf %5, %6 : vector<8x32xf32>
    %c0_6 = arith.constant 0 : index
    %c0_7 = arith.constant 0 : index
    %8 = vector.load %arg4[%c0_6, %c0_7] : memref<32x32xf32, #tpu.memory_space<vmem>>, vector<32x32xf32>
    %cst_8 = arith.constant dense<0.000000e+00> : vector<8x32xf32>
    %9 = tpu.matmul %7, %8, %cst_8 {dimension_numbers = #tpu.dot_dimension_numbers<[1], [0], [0], [1], [0, 0, 1, 1], [], []>} : vector<8x32xf32>, vector<32x32xf32>, vector<8x32xf32> -> vector<8x32xf32>
    %c0_9 = arith.constant 0 : index
    %c0_10 = arith.constant 0 : index
    %10 = vector.load %arg5[%c0_9, %c0_10] : memref<1x32xf32, #tpu.memory_space<vmem>>, vector<1x32xf32>
    %11 = vector.broadcast %10 : vector<1x32xf32> to vector<8x32xf32>
    %12 = arith.addf %9, %11 : vector<8x32xf32>
    %cst_11 = arith.constant 0.000000e+00 : f32
    %13 = vector.broadcast %cst_11 : f32 to vector<8x32xf32>
    %14 = arith.maximumf %12, %13 : vector<8x32xf32>
    %c0_12 = arith.constant 0 : index
    %c0_13 = arith.constant 0 : index
    %15 = vector.load %arg6[%c0_12, %c0_13] : memref<32x128xf32, #tpu.memory_space<vmem>>, vector<32x128xf32>
    %cst_14 = arith.constant dense<0.000000e+00> : vector<8x128xf32>
    %16 = tpu.matmul %14, %15, %cst_14 {dimension_numbers = #tpu.dot_dimension_numbers<[1], [0], [0], [1], [0, 0, 1, 1], [], []>} : vector<8x32xf32>, vector<32x128xf32>, vector<8x128xf32> -> vector<8x128xf32>
    %c0_15 = arith.constant 0 : index
    %c0_16 = arith.constant 0 : index
    %17 = vector.load %arg7[%c0_15, %c0_16] : memref<1x128xf32, #tpu.memory_space<vmem>>, vector<1x128xf32>
    %18 = vector.broadcast %17 : vector<1x128xf32> to vector<8x128xf32>
    %19 = arith.addf %16, %18 : vector<8x128xf32>
    %c0_17 = arith.constant 0 : index
    %c0_18 = arith.constant 0 : index
    %20 = vector.load %arg12[%c0_17, %c0_18] : memref<8x128xf32, #tpu.memory_space<vmem>>, vector<8x128xf32>
    tpu.vector_store %arg12[%c0_17, %c0_18], %19 {strides = array<i32>} : memref<8x128xf32, #tpu.memory_space<vmem>>, vector<8x128xf32>,
    %c0_19 = arith.constant 0 : index
    %c0_20 = arith.constant 0 : index
    %21 = vector.load %arg8[%c0_19, %c0_20] : memref<128x32xf32, #tpu.memory_space<vmem>>, vector<128x32xf32>
    %cst_21 = arith.constant dense<0.000000e+00> : vector<8x32xf32>
    %22 = tpu.matmul %19, %21, %cst_21 {dimension_numbers = #tpu.dot_dimension_numbers<[1], [0], [0], [1], [0, 0, 1, 1], [], []>} : vector<8x128xf32>, vector<128x32xf32>, vector<8x32xf32> -> vector<8x32xf32>
    %c0_22 = arith.constant 0 : index
    %c0_23 = arith.constant 0 : index
    %23 = vector.load %arg9[%c0_22, %c0_23] : memref<1x32xf32, #tpu.memory_space<vmem>>, vector<1x32xf32>
    %24 = vector.broadcast %23 : vector<1x32xf32> to vector<8x32xf32>
    %25 = arith.addf %22, %24 : vector<8x32xf32>
    %cst_24 = arith.constant 0.000000e+00 : f32
    %26 = vector.broadcast %cst_24 : f32 to vector<8x32xf32>
    %27 = arith.maximumf %25, %26 : vector<8x32xf32>
    %c0_25 = arith.constant 0 : index
    %c0_26 = arith.constant 0 : index
    %28 = vector.load %arg10[%c0_25, %c0_26] : memref<32x128xf32, #tpu.memory_space<vmem>>, vector<32x128xf32>
    %cst_27 = arith.constant dense<0.000000e+00> : vector<8x128xf32>
    %29 = tpu.matmul %27, %28, %cst_27 {dimension_numbers = #tpu.dot_dimension_numbers<[1], [0], [0], [1], [0, 0, 1, 1], [], []>} : vector<8x32xf32>, vector<32x128xf32>, vector<8x128xf32> -> vector<8x128xf32>
    %c0_28 = arith.constant 0 : index
    %c0_29 = arith.constant 0 : index
    %30 = vector.load %arg11[%c0_28, %c0_29] : memref<1x128xf32, #tpu.memory_space<vmem>>, vector<1x128xf32>
    %31 = vector.broadcast %30 : vector<1x128xf32> to vector<8x128xf32>
    %32 = arith.addf %29, %31 : vector<8x128xf32>
    %c0_30 = arith.constant 0 : index
    %c0_31 = arith.constant 0 : index
    %33 = vector.load %arg13[%c0_30, %c0_31] : memref<8x128xf32, #tpu.memory_space<vmem>>, vector<8x128xf32>
    tpu.vector_store %arg13[%c0_30, %c0_31], %32 {strides = array<i32>} : memref<8x128xf32, #tpu.memory_space<vmem>>, vector<8x128xf32>,
    return
  }
  func.func @transform_0(%arg0: i32) -> (i32, i32) {
    %c0_i32 = arith.constant 0 : i32
    %c0_i32_0 = arith.constant 0 : i32
    return %arg0, %c0_i32 : i32, i32
  }
  func.func @transform_1(%arg0: i32) -> (i32, i32) {
    %c0_i32 = arith.constant 0 : i32
    %c0_i32_0 = arith.constant 0 : i32
    %c0_i32_1 = arith.constant 0 : i32
    return %c0_i32, %c0_i32_0 : i32, i32
  }
  func.func @transform_2(%arg0: i32) -> (i32, i32) {
    %c0_i32 = arith.constant 0 : i32
    %c0_i32_0 = arith.constant 0 : i32
    %c0_i32_1 = arith.constant 0 : i32
    return %c0_i32, %c0_i32_0 : i32, i32
  }
  func.func @transform_3(%arg0: i32) -> (i32, i32) {
    %c0_i32 = arith.constant 0 : i32
    %c0_i32_0 = arith.constant 0 : i32
    %c0_i32_1 = arith.constant 0 : i32
    return %c0_i32, %c0_i32_0 : i32, i32
  }
  func.func @transform_4(%arg0: i32) -> (i32, i32) {
    %c0_i32 = arith.constant 0 : i32
    %c0_i32_0 = arith.constant 0 : i32
    %c0_i32_1 = arith.constant 0 : i32
    return %c0_i32, %c0_i32_0 : i32, i32
  }
  func.func @transform_5(%arg0: i32) -> (i32, i32) {
    %c0_i32 = arith.constant 0 : i32
    %c0_i32_0 = arith.constant 0 : i32
    %c0_i32_1 = arith.constant 0 : i32
    return %c0_i32, %c0_i32_0 : i32, i32
  }
  func.func @transform_6(%arg0: i32) -> (i32, i32) {
    %c0_i32 = arith.constant 0 : i32
    %c0_i32_0 = arith.constant 0 : i32
    %c0_i32_1 = arith.constant 0 : i32
    return %c0_i32, %c0_i32_0 : i32, i32
  }
  func.func @transform_7(%arg0: i32) -> (i32, i32) {
    %c0_i32 = arith.constant 0 : i32
    %c0_i32_0 = arith.constant 0 : i32
    %c0_i32_1 = arith.constant 0 : i32
    return %c0_i32, %c0_i32_0 : i32, i32
  }
  func.func @transform_8(%arg0: i32) -> (i32, i32) {
    %c0_i32 = arith.constant 0 : i32
    %c0_i32_0 = arith.constant 0 : i32
    %c0_i32_1 = arith.constant 0 : i32
    return %c0_i32, %c0_i32_0 : i32, i32
  }
  func.func @transform_9(%arg0: i32) -> (i32, i32) {
    %c0_i32 = arith.constant 0 : i32
    %c0_i32_0 = arith.constant 0 : i32
    %c0_i32_1 = arith.constant 0 : i32
    return %c0_i32, %c0_i32_0 : i32, i32
  }
  func.func @transform_10(%arg0: i32) -> (i32, i32) {
    %c0_i32 = arith.constant 0 : i32
    %c0_i32_0 = arith.constant 0 : i32
    %c0_i32_1 = arith.constant 0 : i32
    return %c0_i32, %c0_i32_0 : i32, i32
  }
  func.func @transform_11(%arg0: i32) -> (i32, i32) {
    %c0_i32 = arith.constant 0 : i32
    %c0_i32_0 = arith.constant 0 : i32
    return %arg0, %c0_i32 : i32, i32
  }
  func.func @transform_12(%arg0: i32) -> (i32, i32) {
    %c0_i32 = arith.constant 0 : i32
    %c0_i32_0 = arith.constant 0 : i32
    return %arg0, %c0_i32 : i32, i32
  }
}

</mosaic_0001>

<bundles_post_ra>
// kernel: tpu_custom_call.1
= control target key start
LH: loop header
LB: loop body
LE: loop exit
PB: predicated region body
PF: predicated region fallthrough
CT: control target
= control target key end

     0   :  { %18 = vsyncpa [#allocation3], 0  ;;  %v732_v3 = vmov 0.0|0.0   ;;  %vm733_vm0 = vmmov 0   ;;  %v734_v6 = vmov 0.0   ;;  %s970_s0 = inlined_call_operand.vmem [shape: f32[8,32], index: 0, kind: input, shape index: {}]   ;;  %s971_s1 = inlined_call_operand.vmem [shape: f32[32,32], index: 1, kind: input, shape index: {}]   ;;  %s972_s2 = inlined_call_operand.vmem [shape: f32[1,32], index: 2, kind: input, shape index: {}]   ;;  %s973_s3 = inlined_call_operand.vmem [shape: f32[32,32], index: 3, kind: input, shape index: {}]   ;;  %s974_s4 = inlined_call_operand.vmem [shape: f32[1,32], index: 4, kind: input, shape index: {}]   ;;  %s975_s5 = inlined_call_operand.vmem [shape: f32[32,128], index: 5, kind: input, shape index: {}]   ;;  %s976_s6 = inlined_call_operand.vmem [shape: f32[1,128], index: 6, kind: input, shape index: {}]   ;;  %s977_s7 = inlined_call_operand.vmem [shape: f32[128,32], index: 7, kind: input, shape index: {}]   ;;  %s978_s8 = inlined_call_operand.vmem [shape: f32[1,32], index: 8, kind: input, shape index: {}]   ;;  %s979_s9 = inlined_call_operand.vmem [shape: f32[32,128], index: 9, kind: input, shape index: {}]   ;;  %s980_s10 = inlined_call_operand.vmem [shape: f32[1,128], index: 10, kind: input, shape index: {}]   ;;  %s981_s11 = inlined_call_operand.hbm [shape: f32[8,128], index: 11, kind: output, shape index: {0}]   ;;  %s982_s12 = inlined_call_operand.hbm [shape: f32[8,128], index: 12, kind: output, shape index: {1}]  }
   0x1   :  { %v43_v0 = vld [vmem:[%s971_s1] sm:$0xff]  ;;  %v44_v1 = vld [vmem:[%s971_s1 + $0x8] sm:$0xff]  ;;  %v45_v2 = vld [vmem:[%s971_s1 + $0x10] sm:$0xff]  ;;  %631 = vmatprep.subr.bf16.mxu0 %v732_v3  ;;  %560 = vmatprep.mubr.msk.f32.mxu0 %vm733_vm0, %v734_v6 }
   0x2   :  { %v632_v4 = vpack.c.bf16 %v44_v1, %v43_v0  ;;  %v46_v5 = vld [vmem:[%s971_s1 + $0x18] sm:$0xff]  ;;  %649 = vmatprep.subr.bf16.mxu1 %v732_v3  ;;  %617 = vmatprep.mubr.msk.f32.mxu1 %vm733_vm0, %v734_v6 }
   0x3   :  { %19 = vsyncpa [#allocation5], 0  ;;  %v635_v7 = vpack.c.bf16 %v46_v5, %v45_v2  ;;  %v129_v8 = vld [vmem:[%s973_s3] sm:$0xff]  ;;  %v130_v9 = vld [vmem:[%s973_s3 + $0x8] sm:$0xff]  ;;  %vm54_vm1 = vcmask 261120  }
   0x4   :  { %633 = vmatpush3.bf16.msra.mxu0 %v632_v4  ;;  %v42_v10 = vld [vmem:[%s970_s0] sm:$0xff]  ;;  %v638_v11 = vpack.c.bf16 %v130_v9, %v129_v8  ;;  %v131_v12 = vld [vmem:[%s973_s3 + $0x10] sm:$0xff]  ;;  %v132_v13 = vld [vmem:[%s973_s3 + $0x18] sm:$0xff] }
   0x5   :  { %634 = vmatprep.subr.bf16.mxu0 %v732_v3  ;;  %v641_v14 = vpack.c.bf16 %v132_v13, %v131_v12  ;;  %v506_v15 = vld [vmem:[%s972_s2] ss:$0 sm:$0xff]  ;;  %v215_v17 = vld [vmem:[%s975_s5 + $0x8] sm:$0xff]  ;;  %v216_v23 = vld [vmem:[%s975_s5 + $0x10] sm:$0xff] }
   0x6   :  { %v214_v16 = vld [vmem:[%s975_s5] sm:$0xff]  ;;  %v217_v24 = vld [vmem:[%s975_s5 + $0x18] sm:$0xff]  ;;  %v300_v27 = vld [vmem:[%s977_s7 + $0x8] sm:$0xff] }
   0x7   :  { %v644_v21 = vpack.c.bf16 %v215_v17, %v214_v16  ;;  %v647_v25 = vpack.c.bf16 %v217_v24, %v216_v23  ;;  %v299_v26 = vld [vmem:[%s977_s7] sm:$0xff]  ;;  %v301_v28 = vld [vmem:[%s977_s7 + $0x10] sm:$0xff]  ;;  %v302_v30 = vld [vmem:[%s977_s7 + $0x18] sm:$0xff] }
   0x8   :  { %636 = vmatpush3.bf16.msra.mxu0 %v635_v7  ;;  %v650_v29 = vpack.c.bf16 %v300_v27, %v299_v26  ;;  %v653_v31 = vpack.c.bf16 %v302_v30, %v301_v28  ;;  %v303_v32 = vld [vmem:[%s977_s7 + $0x20] sm:$0xff]  ;;  %v304_v33 = vld [vmem:[%s977_s7 + $0x28] sm:$0xff]  ;;  %v305_v35 = vld [vmem:[%s977_s7 + $0x30] sm:$0xff] }
   0x9   :  { %637 = vmatprep.subr.bf16.mxu0 %v732_v3  ;;  %v656_v34 = vpack.c.bf16 %v304_v33, %v303_v32  ;;  %v306_v36 = vld [vmem:[%s977_s7 + $0x38] sm:$0xff]  ;;  %v307_v38 = vld [vmem:[%s977_s7 + $0x40] sm:$0xff]  ;;  %v308_v39 = vld [vmem:[%s977_s7 + $0x48] sm:$0xff] }
   0xa   :  { %651 = vmatpush3.bf16.msra.mxu1 %v650_v29  ;;  %v659_v37 = vpack.c.bf16 %v306_v36, %v305_v35  ;;  %v662_v40 = vpack.c.bf16 %v308_v39, %v307_v38  ;;  %v309_v41 = vld [vmem:[%s977_s7 + $0x50] sm:$0xff]  ;;  %v310_v42 = vld [vmem:[%s977_s7 + $0x58] sm:$0xff]  ;;  %v311_v44 = vld [vmem:[%s977_s7 + $0x60] sm:$0xff] }
   0xb   :  { %561 = vmatmul.mubr.msk.f32.vlgmr.msra.gmra.mrb[0].mxu0 %vm54_vm1, %v42_v10  ;;  %652 = vmatprep.subr.bf16.mxu1 %v732_v3  ;;  %v665_v43 = vpack.c.bf16 %v310_v42, %v309_v41  ;;  %v312_v45 = vld [vmem:[%s977_s7 + $0x68] sm:$0xff]  ;;  %v508_v47 = vld [vmem:[%s974_s4] ss:$0 sm:$0xff]  ;;  %v313_v52 = vld [vmem:[%s977_s7 + $0x70] sm:$0xff] }
   0xc   :  { %639 = vmatpush3.bf16.msra.mxu0 %v638_v11  ;;  %571 = vmatprep.mubr.msk.f32.mxu0 %vm733_vm0, %v734_v6  ;;  %v668_v46 = vpack.c.bf16 %v312_v45, %v311_v44  ;;  %v314_v53 = vld [vmem:[%s977_s7 + $0x78] sm:$0xff]  ;;  %v393_v55 = vld [vmem:[%s979_s9] sm:$0xff]  ;;  %v394_v56 = vld [vmem:[%s979_s9 + $0x8] sm:$0xff] }
   0xd   :  { %640 = vmatprep.subr.bf16.mxu0 %v732_v3  ;;  %v671_v54 = vpack.c.bf16 %v314_v53, %v313_v52  ;;  %v674_v57 = vpack.c.bf16 %v394_v56, %v393_v55  ;;  %v510_v58 = vld [vmem:[%s976_s6] ss:$0 sm:$0xff]  ;;  %v395_v62 = vld [vmem:[%s979_s9 + $0x10] sm:$0xff]  ;;  %v396_v63 = vld [vmem:[%s979_s9 + $0x18] sm:$0xff]  ;;  %s735_s6 = smov [#allocation2]  }
   0xe   :  { %654 = vmatpush3.bf16.msra.mxu1 %v653_v31  ;;  %v677_v0 = vpack.c.bf16 %v396_v63, %v395_v62  ;;  %v512_v1 = vld [vmem:[%s978_s8] ss:$0 sm:$0xff]  ;;  %s484_s25 = sshll.u32 %s735_s6, 4  ;;  %s485_s25 = int_to_ptr.vmem [resolvable:$true] %s484_s25 }
   0xf   :  { %655 = vmatprep.subr.bf16.mxu1 %v732_v3  ;;  %s684_s26 = scalar_lea.vmem %s485_s25, 128  ;;  %p689_p1 = scmp.lt.s32.totalorder %s485_s25, %s485_s25 }
  0x10   :  { %642 = vmatpush3.bf16.msra.mxu0 %v641_v14  ;;  %p685_p0 = scmp.ne.s32.totalorder %s485_s25, %s684_s26  ;;  %p690_p2 = scmp.lt.s32.totalorder %s684_s26, %s684_s26 }
  0x11   :  { %643 = vmatprep.subr.bf16.mxu0 %v732_v3 }
  0x12   :  { %657 = vmatpush3.bf16.msra.mxu1 %v656_v34  ;;  %p691_p3 = por %p690_p2, %p689_p1 }
  0x13   :  { %658 = vmatprep.subr.bf16.mxu1 %v732_v3 }
  0x14   :  { %p692_p4 = pnand %p691_p3, %p685_p0 }
  0x16   :  { %660 = vmatpush3.bf16.msra.mxu1 %v659_v37 }
  0x17   :  { %661 = vmatprep.subr.bf16.mxu1 %v732_v3 }
  0x1a   :  { %663 = vmatpush3.bf16.msra.mxu1 %v662_v40 }
  0x1b   :  { %664 = vmatprep.subr.bf16.mxu1 %v732_v3 }
  0x1e   :  { %666 = vmatpush3.bf16.msra.mxu1 %v665_v43 }
  0x1f   :  { %667 = vmatprep.subr.bf16.mxu1 %v732_v3 }
  0x22   :  { %669 = vmatpush3.bf16.msra.mxu1 %v668_v46 }
  0x23   :  { %670 = vmatprep.subr.bf16.mxu1 %v732_v3 }
  0x26   :  { %672 = vmatpush3.bf16.msra.mxu1 %v671_v54 }
  0xde   :  { %v124_v18 = vpop.f32.mrb[0].mxu0 }
  0xdf   :  { %v125_v19 = vadd.f32 %v506_v15, %v124_v18  ;;  %v562_v20 = vpop.f32.mrb[1].mxu0 }
  0xe1   :  { %v128_v22 = vmax.f32 %v125_v19, 0.0 }
  0xe3   :  { %572 = vmatmul.mubr.msk.f32.vlgmr.msra.gmra.mrb[2].mxu0 %vm54_vm1, %v128_v22 }
  0xe4   :  { %645 = vmatpush3.bf16.msra.mxu0 %v644_v21  ;;  %582 = vmatprep.mubr.msk.f32.mxu0 %vm733_vm0, %v734_v6 }
  0xe5   :  { %646 = vmatprep.subr.bf16.mxu0 %v732_v3 }
  0xe8   :  { %648 = vmatpush3.bf16.msra.mxu0 %v647_v25 }
  0xe9   :  { %673 = vmatprep.subr.bf16.mxu0 %v732_v3 }
 0x1b6   :  { %v209_v48 = vpop.f32.mrb[2].mxu0 }
 0x1b7   :  { %v210_v49 = vadd.f32 %v508_v47, %v209_v48  ;;  %v573_v50 = vpop.f32.mrb[3].mxu0 }
 0x1b9   :  { %v213_v51 = vmax.f32 %v210_v49, 0.0 }
 0x1bb   :  { %583 = vmatmul.mubr.msk.f32.vlgmr.msra.gmra.mrb[4].mxu0 %vm54_vm1, %v213_v51 }
 0x1bc   :  { %628 = vmatprep.mubr.msk.f32.mxu0 %vm733_vm0, %v734_v6  ;;  %675 = vmatpush3.bf16.msra.mxu0 %v674_v57 }
 0x1bd   :  { %676 = vmatprep.subr.bf16.mxu0 %v732_v3 }
 0x1c0   :  { %678 = vmatpush3.bf16.msra.mxu0 %v677_v0 }
 0x28e   :  { %v294_v59 = vpop.f32.mrb[4].mxu0 }
 0x28f   :  { %v295_v60 = vadd.f32 %v510_v58, %v294_v59  ;;  %v584_v61 = vpop.f32.mrb[5].mxu0 }
 0x291   :  { %298 = vst [vmem:[#allocation2] sm:$0xff] %v295_v60  ;;  %618 = vmatmul.mubr.f32.vlgmr.msra.gmra.mrb[0].mxu1 %v295_v60 }
 0x364   :  { %v388_v2 = vpop.f32.mrb[0].mxu1 }
 0x365   :  { %v389_v3 = vadd.f32 %v512_v1, %v388_v2  ;;  %v619_v4 = vpop.f32.mrb[1].mxu1 }
 0x367   :  { %v392_v5 = vmax.f32 %v389_v3, 0.0 }
 0x369   :  { %629 = vmatmul.mubr.msk.f32.vlgmr.msra.gmra.mrb[6].mxu0 %vm54_vm1, %v392_v5 }
 0x36a   :  { %695 = shalt.err (!%p692_p4)
}
 0x36b   :  { %s696_s8 = scalar_lea.hbm %s981_s11, 128 }
 0x36c   :  { %p697_p5 = scmp.ne.s32.totalorder %s981_s11, %s696_s8  ;;  %p700_p6 = scmp.lt.u32.totalorder %s696_s8, %s981_s11 }
 0x36e   :  { %p702_p7 = pnand %p700_p6, %p697_p5 }
 0x370   :  { %705 = shalt.err (!%p702_p7)
}
 0x371   :  { %487 = dma.vmem_to_hbm [thread:$0]  %s485_s25, 128, %s981_s11, [#allocation3]   ;;  %v513_v6 = vld [vmem:[%s980_s10] ss:$0 sm:$0xff] }
 0x372   :  { %s736_s16 = smov [#allocation4]  }
 0x373   :  { %s494_s17 = sshll.u32 %s736_s16, 4  ;;  %s495_s17 = int_to_ptr.vmem [resolvable:$true] %s494_s17 }
 0x374   :  { %s706_s4 = scalar_lea.vmem %s495_s17, 128  ;;  %p711_p9 = scmp.lt.s32.totalorder %s495_s17, %s495_s17 }
 0x375   :  { %p707_p8 = scmp.ne.s32.totalorder %s495_s17, %s706_s4  ;;  %p712_p10 = scmp.lt.s32.totalorder %s706_s4, %s706_s4 }
 0x377   :  { %p713_p11 = por %p712_p10, %p711_p9 }
 0x379   :  { %p714_p12 = pnand %p713_p11, %p707_p8 }
 0x43c   :  { %v473_v7 = vpop.f32.mrb[6].mxu0 }
 0x43d   :  { %v474_v8 = vadd.f32 %v513_v6, %v473_v7  ;;  %v630_v9 = vpop.f32.mrb[7].mxu0 }
 0x43f   :  { %477 = vst [vmem:[#allocation4] sm:$0xff] %v474_v8 }
 0x440   :  { %717 = shalt.err (!%p714_p12)
}
 0x441   :  { %s718_s19 = scalar_lea.hbm %s982_s12, 128 }
 0x442   :  { %p719_p13 = scmp.ne.s32.totalorder %s982_s12, %s718_s19  ;;  %p722_p0 = scmp.lt.u32.totalorder %s718_s19, %s982_s12 }
 0x444   :  { %p724_p1 = pnand %p722_p0, %p719_p13 }
 0x446   :  { %727 = shalt.err (!%p724_p1)
}
 0x447   :  { %497 = dma.vmem_to_hbm [thread:$0]  %s495_s17, 128, %s982_s12, [#allocation5]  }
 0x448   :  { %728 = dma.done.wait [#allocation3], 128  }
 0x449   :  { %729 = vsyncadd [#allocation3], 4294967168 }
 0x44a   :  { %730 = dma.done.wait [#allocation5], 128  }
 0x44b   :  { %731 = vsyncadd [#allocation5], 4294967168 }
 0x44c   :  { %504 = vsyncpa [#allocation3], 1 }
 0x44d   :  { %505 = vsyncpa [#allocation5], 1 }

</bundles_post_ra>
